<compile_context>
chip_gen: v5e
topology: v5e:2x2
jax: 0.10.0
libtpu: 0.0.40
codegen_flags: <defaults>
</compile_context>

<pallas_src>
import math

import jax
import jax.numpy as jnp
from jax.experimental import pallas as pl
from jax.experimental.pallas import tpu as pltpu

LANE = 128  # TPU vreg lane width


def _round_up(n, m):
    return ((n + m - 1) // m) * m


def make_mlp_kernel(relu_flags, pad):
    """Full fused MLP hot path on one batch tile: matmul + bias + ReLU per layer."""
    n_layers = len(relu_flags)

    def kernel(x_ref, w_ref, b_ref, o_ref):
        # x_ref:  (TB, in_dim)       native-width activation tile (f32)
        # w_ref:  (L, 128, 128)      packed, zero-padded bf16 weight slab (VMEM-resident)
        # b_ref:  (L, 1, 128)        packed, zero-padded f32 bias slab (VMEM-resident)
        # o_ref:  (TB, out_dim)      compact output tile (f32)
        tb, in_dim = x_ref.shape
        h = x_ref[...]
        if in_dim < pad:
            # Zero-extend to the full 128-lane width inside VMEM (exact: the padded
            # lanes multiply zero-padded weight rows).
            h = jnp.concatenate(
                [h, jnp.zeros((tb, pad - in_dim), h.dtype)], axis=-1)
        # Short fixed layer count -> static unroll is fine (see TODO above).
        for i in range(n_layers):
            w = w_ref[i]            # static slice of the packed slab, no copy
            b = b_ref[i]
            # bf16 operands on the MXU, f32 accumulation; bias/ReLU in f32.
            h = jnp.dot(h.astype(jnp.bfloat16), w,
                        preferred_element_type=jnp.float32) + b
            if relu_flags[i]:
                h = jnp.maximum(h, 0.0)
        o_ref[...] = h[:, : o_ref.shape[-1]].astype(o_ref.dtype)

    return kernel


def _choose_tiles(batch, block_batch, min_steps=2):
    """Adaptive batch tiling.

    Big tiles amortize the ~0.35 us per-grid-step overhead, but we avoid padding
    a non-multiple batch all the way to block_batch, and we aim for >= min_steps
    grid steps so the 'parallel' axis can feed v7x's second TensorCore
    (no-op on single-TC v5e/v6e; tiny batches still get a 1-step grid).
    """
    bp8 = _round_up(max(batch, 1), 8)
    n_steps = max(min_steps, pl.cdiv(bp8, block_batch))
    tb = min(block_batch, _round_up(pl.cdiv(bp8, n_steps), 8))
    tb = max(tb, 8)
    bp = _round_up(bp8, tb)
    return tb, bp


def mlp_forward(x, w_packed, b_packed, relu_flags, out_dim=1, block_batch=2048):
    """x: (batch, in_dim) f32. w_packed: (L, P, P) bf16. b_packed: (L, 1, P) f32."""
    batch, in_dim = x.shape
    n_layers, pad, _ = w_packed.shape

    tb, bp = _choose_tiles(batch, block_batch)
    xp = x if bp == batch else jnp.zeros((bp, in_dim), x.dtype).at[:batch].set(x)

    kernel = make_mlp_kernel(tuple(relu_flags), pad)

    def run(single_buffer_resident):
        if single_buffer_resident and hasattr(pl, "Buffered"):
            # Constant index_map -> slab is fetched once; no need for a 2nd buffer.
            w_spec = pl.BlockSpec((n_layers, pad, pad), lambda i: (0, 0, 0),
                                  pipeline_mode=pl.Buffered(buffer_count=1))
            b_spec = pl.BlockSpec((n_layers, 1, pad), lambda i: (0, 0, 0),
                                  pipeline_mode=pl.Buffered(buffer_count=1))
        else:
            w_spec = pl.BlockSpec((n_layers, pad, pad), lambda i: (0, 0, 0))
            b_spec = pl.BlockSpec((n_layers, 1, pad), lambda i: (0, 0, 0))
        return pl.pallas_call(
            kernel,
            out_shape=jax.ShapeDtypeStruct((bp, out_dim), jnp.float32),
            grid=(bp // tb,),
            in_specs=[
                # native-width x tile: last dim equals full array dim -> legal block
                pl.BlockSpec((tb, in_dim), lambda i: (i, 0)),
                w_spec,
                b_spec,
            ],
            # compact output: last dim equals full array dim -> legal block
            out_specs=pl.BlockSpec((tb, out_dim), lambda i: (i, 0)),
            compiler_params=pltpu.CompilerParams(
                dimension_semantics=("parallel",),   # shards batch tiles across TCs on v7x
                vmem_limit_bytes=32 * 1024 * 1024,
            ),
        )(xp, w_packed, b_packed)

    try:
        out_padded = run(True)
    except Exception:
        # Fall back to default (double-buffered) specs if Buffered(1) is rejected.
        out_padded = run(False)

    return out_padded if bp == batch else out_padded[:batch]


def init_linear(key, in_features, out_features):
    """Deterministic PyTorch-style Linear init: U(-k, k), k = 1/sqrt(in_features)."""
    k = 1.0 / math.sqrt(in_features)
    kw, kb = jax.random.split(key)
    w = jax.random.uniform(kw, (in_features, out_features), jnp.float32, -k, k)
    b = jax.random.uniform(kb, (1, out_features), jnp.float32, -k, k)
    return w, b


def build_network_params(key, fc_nodes_list, input_dim):
    """Replicates NeuralNetwork.__init__ layer structure."""
    assert len(fc_nodes_list) > 2
    layer_dims = [(input_dim, fc_nodes_list[0])]
    relu_flags = [False]
    for layer_num in range(1, len(fc_nodes_list) - 1):
        layer_dims.append((fc_nodes_list[layer_num], fc_nodes_list[layer_num + 1]))
        relu_flags.append(True)
    layer_dims.append((fc_nodes_list[-1], 1))
    relu_flags.append(False)

    params = []
    keys = jax.random.split(key, len(layer_dims))
    for k, (fin, fout) in zip(keys, layer_dims):
        params.append(init_linear(k, fin, fout))
    return params, relu_flags


def pack_params(params, pad=LANE):
    """Zero-pad every layer's (W, b) to (pad, pad)/(1, pad) and stack into two slabs.

    Weights are stored bf16 (MXU-native); biases stay f32 (added after the f32
    accumulation). Zero padding is exact: padded K-rows contribute 0, padded
    output columns stay 0 through bias-add (bias pad is 0) and ReLU.
    """
    n = len(params)
    max_dim = max(max(w.shape) for w, _ in params)
    assert max_dim <= pad, f"layer width {max_dim} exceeds pad width {pad}"
    w_packed = jnp.zeros((n, pad, pad), jnp.bfloat16)
    b_packed = jnp.zeros((n, 1, pad), jnp.float32)
    for i, (w, b) in enumerate(params):
        w_packed = w_packed.at[i, : w.shape[0], : w.shape[1]].set(
            w.astype(jnp.bfloat16))
        b_packed = b_packed.at[i, :, : b.shape[1]].set(b)
    return w_packed, b_packed


if __name__ == "__main__":
    # Small, forward-consistent configuration (fc[0] == fc[1]).
    fc_nodes_list = [32, 32, 32, 32]
    input_dim = 4
    batch = 8

    key = jax.random.PRNGKey(0)
    k_params, k_x = jax.random.split(key)
    params, relu_flags = build_network_params(k_params, fc_nodes_list, input_dim)
    w_packed, b_packed = pack_params(params)

    x = jax.random.normal(k_x, (batch, input_dim), jnp.float32)

    out = mlp_forward(x, w_packed, b_packed, relu_flags, out_dim=1)
    out = jax.block_until_ready(out)
    assert out.shape == (batch, 1)

    # Reference 1: same bf16-operand / f32-accumulate numerics as the kernel.
    h = x
    for (w, b), use_relu in zip(params, relu_flags):
        h = jnp.dot(h.astype(jnp.bfloat16), w.astype(jnp.bfloat16),
                    preferred_element_type=jnp.float32) + b
        if use_relu:
            h = jnp.maximum(h, 0.0)
    assert jnp.allclose(out, h, rtol=1e-3, atol=1e-3), "mismatch vs bf16 reference"

    # Reference 2: pure f32 (PyTorch semantics), loose tolerance for the bf16 cast.
    hf = x
    for (w, b), use_relu in zip(params, relu_flags):
        hf = hf @ w + b
        if use_relu:
            hf = jnp.maximum(hf, 0.0)
    assert jnp.allclose(out, hf, rtol=5e-2, atol=5e-2), "mismatch vs f32 reference"

    print("KERNEL_OK")
</pallas_src>

<mosaic_0001>
module attributes {stable_mosaic.version = 11 : i64} {
  func.func @kernel(%arg0: i32, %arg1: memref<8x4xf32, #tpu.memory_space<vmem>>, %arg2: memref<4x128x128xbf16, #tpu.memory_space<vmem>>, %arg3: memref<4x1x128xf32, #tpu.memory_space<vmem>>, %arg4: memref<8x1xf32, #tpu.memory_space<vmem>>) attributes {dimension_semantics = [#tpu.dimension_semantics<parallel>], iteration_bounds = array<i64: 1>, scalar_prefetch = 0 : i64, scratch_operands = 0 : i64, tpu.core_type = #tpu.core_type<tc>, window_params = [{transform_indices = @transform_0, window_bounds = array<i64: 8, 4>}, {pipeline_mode = #tpu.pipeline_mode<synchronous>, transform_indices = @transform_1, window_bounds = array<i64: 4, 128, 128>}, {pipeline_mode = #tpu.pipeline_mode<synchronous>, transform_indices = @transform_2, window_bounds = array<i64: 4, 1, 128>}, {transform_indices = @transform_3, window_bounds = array<i64: 8, 1>}]} {
    %c0 = arith.constant 0 : index
    %c0_0 = arith.constant 0 : index
    %0 = vector.load %arg1[%c0, %c0_0] : memref<8x4xf32, #tpu.memory_space<vmem>>, vector<8x4xf32>
    %cst = arith.constant 0.000000e+00 : f32
    %1 = vector.broadcast %cst : f32 to vector<8x124xf32>
    %2 = tpu.concatenate %0, %1 in 1 : vector<8x4xf32>, vector<8x124xf32> -> vector<8x128xf32>
    %c0_1 = arith.constant 0 : index
    %c0_2 = arith.constant 0 : index
    %c0_3 = arith.constant 0 : index
    %3 = vector.load %arg2[%c0_1, %c0_2, %c0_3] : memref<4x128x128xbf16, #tpu.memory_space<vmem>>, vector<1x128x128xbf16>
    %4 = vector.shape_cast %3 : vector<1x128x128xbf16> to vector<128x128xbf16>
    %c0_4 = arith.constant 0 : index
    %c0_5 = arith.constant 0 : index
    %c0_6 = arith.constant 0 : index
    %5 = vector.load %arg3[%c0_4, %c0_5, %c0_6] : memref<4x1x128xf32, #tpu.memory_space<vmem>>, vector<1x1x128xf32>
    %6 = vector.shape_cast %5 : vector<1x1x128xf32> to vector<1x128xf32>
    %7 = arith.truncf %2 : vector<8x128xf32> to vector<8x128xbf16>
    %cst_7 = arith.constant dense<0.000000e+00> : vector<8x128xf32>
    %8 = tpu.matmul %7, %4, %cst_7 {dimension_numbers = #tpu.dot_dimension_numbers<[1], [0], [0], [1], [0, 0, 1, 1], [], []>} : vector<8x128xbf16>, vector<128x128xbf16>, vector<8x128xf32> -> vector<8x128xf32>
    %9 = vector.broadcast %6 : vector<1x128xf32> to vector<8x128xf32>
    %10 = arith.addf %8, %9 : vector<8x128xf32>
    %c1 = arith.constant 1 : index
    %c0_8 = arith.constant 0 : index
    %c0_9 = arith.constant 0 : index
    %11 = vector.load %arg2[%c1, %c0_8, %c0_9] : memref<4x128x128xbf16, #tpu.memory_space<vmem>>, vector<1x128x128xbf16>
    %12 = vector.shape_cast %11 : vector<1x128x128xbf16> to vector<128x128xbf16>
    %c1_10 = arith.constant 1 : index
    %c0_11 = arith.constant 0 : index
    %c0_12 = arith.constant 0 : index
    %13 = vector.load %arg3[%c1_10, %c0_11, %c0_12] : memref<4x1x128xf32, #tpu.memory_space<vmem>>, vector<1x1x128xf32>
    %14 = vector.shape_cast %13 : vector<1x1x128xf32> to vector<1x128xf32>
    %15 = arith.truncf %10 : vector<8x128xf32> to vector<8x128xbf16>
    %cst_13 = arith.constant dense<0.000000e+00> : vector<8x128xf32>
    %16 = tpu.matmul %15, %12, %cst_13 {dimension_numbers = #tpu.dot_dimension_numbers<[1], [0], [0], [1], [0, 0, 1, 1], [], []>} : vector<8x128xbf16>, vector<128x128xbf16>, vector<8x128xf32> -> vector<8x128xf32>
    %17 = vector.broadcast %14 : vector<1x128xf32> to vector<8x128xf32>
    %18 = arith.addf %16, %17 : vector<8x128xf32>
    %cst_14 = arith.constant 0.000000e+00 : f32
    %19 = vector.broadcast %cst_14 : f32 to vector<8x128xf32>
    %20 = arith.maximumf %18, %19 : vector<8x128xf32>
    %c2 = arith.constant 2 : index
    %c0_15 = arith.constant 0 : index
    %c0_16 = arith.constant 0 : index
    %21 = vector.load %arg2[%c2, %c0_15, %c0_16] : memref<4x128x128xbf16, #tpu.memory_space<vmem>>, vector<1x128x128xbf16>
    %22 = vector.shape_cast %21 : vector<1x128x128xbf16> to vector<128x128xbf16>
    %c2_17 = arith.constant 2 : index
    %c0_18 = arith.constant 0 : index
    %c0_19 = arith.constant 0 : index
    %23 = vector.load %arg3[%c2_17, %c0_18, %c0_19] : memref<4x1x128xf32, #tpu.memory_space<vmem>>, vector<1x1x128xf32>
    %24 = vector.shape_cast %23 : vector<1x1x128xf32> to vector<1x128xf32>
    %25 = arith.truncf %20 : vector<8x128xf32> to vector<8x128xbf16>
    %cst_20 = arith.constant dense<0.000000e+00> : vector<8x128xf32>
    %26 = tpu.matmul %25, %22, %cst_20 {dimension_numbers = #tpu.dot_dimension_numbers<[1], [0], [0], [1], [0, 0, 1, 1], [], []>} : vector<8x128xbf16>, vector<128x128xbf16>, vector<8x128xf32> -> vector<8x128xf32>
    %27 = vector.broadcast %24 : vector<1x128xf32> to vector<8x128xf32>
    %28 = arith.addf %26, %27 : vector<8x128xf32>
    %cst_21 = arith.constant 0.000000e+00 : f32
    %29 = vector.broadcast %cst_21 : f32 to vector<8x128xf32>
    %30 = arith.maximumf %28, %29 : vector<8x128xf32>
    %c3 = arith.constant 3 : index
    %c0_22 = arith.constant 0 : index
    %c0_23 = arith.constant 0 : index
    %31 = vector.load %arg2[%c3, %c0_22, %c0_23] : memref<4x128x128xbf16, #tpu.memory_space<vmem>>, vector<1x128x128xbf16>
    %32 = vector.shape_cast %31 : vector<1x128x128xbf16> to vector<128x128xbf16>
    %c3_24 = arith.constant 3 : index
    %c0_25 = arith.constant 0 : index
    %c0_26 = arith.constant 0 : index
    %33 = vector.load %arg3[%c3_24, %c0_25, %c0_26] : memref<4x1x128xf32, #tpu.memory_space<vmem>>, vector<1x1x128xf32>
    %34 = vector.shape_cast %33 : vector<1x1x128xf32> to vector<1x128xf32>
    %35 = arith.truncf %30 : vector<8x128xf32> to vector<8x128xbf16>
    %cst_27 = arith.constant dense<0.000000e+00> : vector<8x128xf32>
    %36 = tpu.matmul %35, %32, %cst_27 {dimension_numbers = #tpu.dot_dimension_numbers<[1], [0], [0], [1], [0, 0, 1, 1], [], []>} : vector<8x128xbf16>, vector<128x128xbf16>, vector<8x128xf32> -> vector<8x128xf32>
    %37 = vector.broadcast %34 : vector<1x128xf32> to vector<8x128xf32>
    %38 = arith.addf %36, %37 : vector<8x128xf32>
    %39 = vector.extract_strided_slice %38 {offsets = [0, 0], sizes = [8, 1], strides = [1, 1]} : vector<8x128xf32> to vector<8x1xf32>
    %c0_28 = arith.constant 0 : index
    %c0_29 = arith.constant 0 : index
    %40 = vector.load %arg4[%c0_28, %c0_29] : memref<8x1xf32, #tpu.memory_space<vmem>>, vector<8x1xf32>
    tpu.vector_store %arg4[%c0_28, %c0_29], %39 {strides = array<i32>} : memref<8x1xf32, #tpu.memory_space<vmem>>, vector<8x1xf32>,
    return
  }
  func.func @transform_0(%arg0: i32) -> (i32, i32) {
    %c0_i32 = arith.constant 0 : i32
    %c0_i32_0 = arith.constant 0 : i32
    return %arg0, %c0_i32 : i32, i32
  }
  func.func @transform_1(%arg0: i32) -> (i32, i32, i32) {
    %c0_i32 = arith.constant 0 : i32
    %c0_i32_0 = arith.constant 0 : i32
    %c0_i32_1 = arith.constant 0 : i32
    %c0_i32_2 = arith.constant 0 : i32
    return %c0_i32, %c0_i32_0, %c0_i32_1 : i32, i32, i32
  }
  func.func @transform_2(%arg0: i32) -> (i32, i32, i32) {
    %c0_i32 = arith.constant 0 : i32
    %c0_i32_0 = arith.constant 0 : i32
    %c0_i32_1 = arith.constant 0 : i32
    %c0_i32_2 = arith.constant 0 : i32
    return %c0_i32, %c0_i32_0, %c0_i32_1 : i32, i32, i32
  }
  func.func @transform_3(%arg0: i32) -> (i32, i32) {
    %c0_i32 = arith.constant 0 : i32
    %c0_i32_0 = arith.constant 0 : i32
    return %arg0, %c0_i32 : i32, i32
  }
}

module attributes {stable_mosaic.version = 11 : i64} {
  func.func @kernel(%arg0: i32, %arg1: memref<8x4xf32, #tpu.memory_space<vmem>>, %arg2: memref<4x128x128xbf16, #tpu.memory_space<vmem>>, %arg3: memref<4x1x128xf32, #tpu.memory_space<vmem>>, %arg4: memref<8x1xf32, #tpu.memory_space<vmem>>) attributes {dimension_semantics = [#tpu.dimension_semantics<parallel>], iteration_bounds = array<i64: 1>, scalar_prefetch = 0 : i64, scratch_operands = 0 : i64, tpu.core_type = #tpu.core_type<tc>, window_params = [{transform_indices = @transform_0, window_bounds = array<i64: 8, 4>}, {pipeline_mode = #tpu.pipeline_mode<synchronous>, transform_indices = @transform_1, window_bounds = array<i64: 4, 128, 128>}, {pipeline_mode = #tpu.pipeline_mode<synchronous>, transform_indices = @transform_2, window_bounds = array<i64: 4, 1, 128>}, {transform_indices = @transform_3, window_bounds = array<i64: 8, 1>}]} {
    %c0 = arith.constant 0 : index
    %c0_0 = arith.constant 0 : index
    %0 = vector.load %arg1[%c0, %c0_0] : memref<8x4xf32, #tpu.memory_space<vmem>>, vector<8x4xf32>
    %cst = arith.constant 0.000000e+00 : f32
    %1 = vector.broadcast %cst : f32 to vector<8x124xf32>
    %2 = tpu.concatenate %0, %1 in 1 : vector<8x4xf32>, vector<8x124xf32> -> vector<8x128xf32>
    %c0_1 = arith.constant 0 : index
    %c0_2 = arith.constant 0 : index
    %c0_3 = arith.constant 0 : index
    %3 = vector.load %arg2[%c0_1, %c0_2, %c0_3] : memref<4x128x128xbf16, #tpu.memory_space<vmem>>, vector<1x128x128xbf16>
    %4 = vector.shape_cast %3 : vector<1x128x128xbf16> to vector<128x128xbf16>
    %c0_4 = arith.constant 0 : index
    %c0_5 = arith.constant 0 : index
    %c0_6 = arith.constant 0 : index
    %5 = vector.load %arg3[%c0_4, %c0_5, %c0_6] : memref<4x1x128xf32, #tpu.memory_space<vmem>>, vector<1x1x128xf32>
    %6 = vector.shape_cast %5 : vector<1x1x128xf32> to vector<1x128xf32>
    %7 = arith.truncf %2 : vector<8x128xf32> to vector<8x128xbf16>
    %cst_7 = arith.constant dense<0.000000e+00> : vector<8x128xf32>
    %8 = tpu.matmul %7, %4, %cst_7 {dimension_numbers = #tpu.dot_dimension_numbers<[1], [0], [0], [1], [0, 0, 1, 1], [], []>} : vector<8x128xbf16>, vector<128x128xbf16>, vector<8x128xf32> -> vector<8x128xf32>
    %9 = vector.broadcast %6 : vector<1x128xf32> to vector<8x128xf32>
    %10 = arith.addf %8, %9 : vector<8x128xf32>
    %c1 = arith.constant 1 : index
    %c0_8 = arith.constant 0 : index
    %c0_9 = arith.constant 0 : index
    %11 = vector.load %arg2[%c1, %c0_8, %c0_9] : memref<4x128x128xbf16, #tpu.memory_space<vmem>>, vector<1x128x128xbf16>
    %12 = vector.shape_cast %11 : vector<1x128x128xbf16> to vector<128x128xbf16>
    %c1_10 = arith.constant 1 : index
    %c0_11 = arith.constant 0 : index
    %c0_12 = arith.constant 0 : index
    %13 = vector.load %arg3[%c1_10, %c0_11, %c0_12] : memref<4x1x128xf32, #tpu.memory_space<vmem>>, vector<1x1x128xf32>
    %14 = vector.shape_cast %13 : vector<1x1x128xf32> to vector<1x128xf32>
    %15 = arith.truncf %10 : vector<8x128xf32> to vector<8x128xbf16>
    %cst_13 = arith.constant dense<0.000000e+00> : vector<8x128xf32>
    %16 = tpu.matmul %15, %12, %cst_13 {dimension_numbers = #tpu.dot_dimension_numbers<[1], [0], [0], [1], [0, 0, 1, 1], [], []>} : vector<8x128xbf16>, vector<128x128xbf16>, vector<8x128xf32> -> vector<8x128xf32>
    %17 = vector.broadcast %14 : vector<1x128xf32> to vector<8x128xf32>
    %18 = arith.addf %16, %17 : vector<8x128xf32>
    %cst_14 = arith.constant 0.000000e+00 : f32
    %19 = vector.broadcast %cst_14 : f32 to vector<8x128xf32>
    %20 = arith.maximumf %18, %19 : vector<8x128xf32>
    %c2 = arith.constant 2 : index
    %c0_15 = arith.constant 0 : index
    %c0_16 = arith.constant 0 : index
    %21 = vector.load %arg2[%c2, %c0_15, %c0_16] : memref<4x128x128xbf16, #tpu.memory_space<vmem>>, vector<1x128x128xbf16>
    %22 = vector.shape_cast %21 : vector<1x128x128xbf16> to vector<128x128xbf16>
    %c2_17 = arith.constant 2 : index
    %c0_18 = arith.constant 0 : index
    %c0_19 = arith.constant 0 : index
    %23 = vector.load %arg3[%c2_17, %c0_18, %c0_19] : memref<4x1x128xf32, #tpu.memory_space<vmem>>, vector<1x1x128xf32>
    %24 = vector.shape_cast %23 : vector<1x1x128xf32> to vector<1x128xf32>
    %25 = arith.truncf %20 : vector<8x128xf32> to vector<8x128xbf16>
    %cst_20 = arith.constant dense<0.000000e+00> : vector<8x128xf32>
    %26 = tpu.matmul %25, %22, %cst_20 {dimension_numbers = #tpu.dot_dimension_numbers<[1], [0], [0], [1], [0, 0, 1, 1], [], []>} : vector<8x128xbf16>, vector<128x128xbf16>, vector<8x128xf32> -> vector<8x128xf32>
    %27 = vector.broadcast %24 : vector<1x128xf32> to vector<8x128xf32>
    %28 = arith.addf %26, %27 : vector<8x128xf32>
    %cst_21 = arith.constant 0.000000e+00 : f32
    %29 = vector.broadcast %cst_21 : f32 to vector<8x128xf32>
    %30 = arith.maximumf %28, %29 : vector<8x128xf32>
    %c3 = arith.constant 3 : index
    %c0_22 = arith.constant 0 : index
    %c0_23 = arith.constant 0 : index
    %31 = vector.load %arg2[%c3, %c0_22, %c0_23] : memref<4x128x128xbf16, #tpu.memory_space<vmem>>, vector<1x128x128xbf16>
    %32 = vector.shape_cast %31 : vector<1x128x128xbf16> to vector<128x128xbf16>
    %c3_24 = arith.constant 3 : index
    %c0_25 = arith.constant 0 : index
    %c0_26 = arith.constant 0 : index
    %33 = vector.load %arg3[%c3_24, %c0_25, %c0_26] : memref<4x1x128xf32, #tpu.memory_space<vmem>>, vector<1x1x128xf32>
    %34 = vector.shape_cast %33 : vector<1x1x128xf32> to vector<1x128xf32>
    %35 = arith.truncf %30 : vector<8x128xf32> to vector<8x128xbf16>
    %cst_27 = arith.constant dense<0.000000e+00> : vector<8x128xf32>
    %36 = tpu.matmul %35, %32, %cst_27 {dimension_numbers = #tpu.dot_dimension_numbers<[1], [0], [0], [1], [0, 0, 1, 1], [], []>} : vector<8x128xbf16>, vector<128x128xbf16>, vector<8x128xf32> -> vector<8x128xf32>
    %37 = vector.broadcast %34 : vector<1x128xf32> to vector<8x128xf32>
    %38 = arith.addf %36, %37 : vector<8x128xf32>
    %39 = vector.extract_strided_slice %38 {offsets = [0, 0], sizes = [8, 1], strides = [1, 1]} : vector<8x128xf32> to vector<8x1xf32>
    %c0_28 = arith.constant 0 : index
    %c0_29 = arith.constant 0 : index
    %40 = vector.load %arg4[%c0_28, %c0_29] : memref<8x1xf32, #tpu.memory_space<vmem>>, vector<8x1xf32>
    tpu.vector_store %arg4[%c0_28, %c0_29], %39 {strides = array<i32>} : memref<8x1xf32, #tpu.memory_space<vmem>>, vector<8x1xf32>,
    return
  }
  func.func @transform_0(%arg0: i32) -> (i32, i32) {
    %c0_i32 = arith.constant 0 : i32
    %c0_i32_0 = arith.constant 0 : i32
    return %arg0, %c0_i32 : i32, i32
  }
  func.func @transform_1(%arg0: i32) -> (i32, i32, i32) {
    %c0_i32 = arith.constant 0 : i32
    %c0_i32_0 = arith.constant 0 : i32
    %c0_i32_1 = arith.constant 0 : i32
    %c0_i32_2 = arith.constant 0 : i32
    return %c0_i32, %c0_i32_0, %c0_i32_1 : i32, i32, i32
  }
  func.func @transform_2(%arg0: i32) -> (i32, i32, i32) {
    %c0_i32 = arith.constant 0 : i32
    %c0_i32_0 = arith.constant 0 : i32
    %c0_i32_1 = arith.constant 0 : i32
    %c0_i32_2 = arith.constant 0 : i32
    return %c0_i32, %c0_i32_0, %c0_i32_1 : i32, i32, i32
  }
  func.func @transform_3(%arg0: i32) -> (i32, i32) {
    %c0_i32 = arith.constant 0 : i32
    %c0_i32_0 = arith.constant 0 : i32
    return %arg0, %c0_i32 : i32, i32
  }
}

</mosaic_0001>

<bundles_post_ra>
// kernel: tpu_custom_call.1
= control target key start
LH: loop header
LB: loop body
LE: loop exit
PB: predicated region body
PF: predicated region fallthrough
CT: control target
= control target key end

     0   :  { %8 = vsyncpa [#allocation3], 0  ;;  %s575_s15 = smov [#allocation2]   ;;  %s576_s17 = smov 64   ;;  %s619_s0 = inlined_call_operand.vmem [shape: f32[8,4], index: 0, kind: input, shape index: {}]   ;;  %s620_s1 = inlined_call_operand.hbm [shape: bf16[4,128,128], index: 1, kind: input, shape index: {}]   ;;  %s621_s2 = inlined_call_operand.vmem [shape: f32[4,1,128], index: 2, kind: input, shape index: {}]   ;;  %s622_s3 = inlined_call_operand.vmem [shape: f32[8,1], index: 3, kind: output, shape index: {}]  }
   0x1   :  { %s15_s14 = sshll.u32 %s620_s1, 4  ;;  %s17_s16 = sshll.u32 %s575_s15, 4  ;;  %s16_s14 = int_to_ptr.hbm [resolvable:$true] %s15_s14  ;;  %s18_s16 = int_to_ptr.vmem [resolvable:$true] %s17_s16 }
   0x2   :  { %s577_s18 = smov 4  }
   0x3   :  { %23 = dma.hbm_to_vmem [thread:$0]  %s16_s14, 4096, %s18_s16, [#allocation3], %s576_s17, %s576_s17, %s577_s18  }
   0x4   :  { %573 = dma.done.wait [#allocation3], 4096  }
   0x5   :  { %574 = vsyncadd [#allocation3], 4294963200  ;;  %v517_v0 = vld [vmem:[#allocation2 + $0x38] sm:$0xff]  ;;  %v516_v1 = vld [vmem:[#allocation2 + $0x30] sm:$0xff]  ;;  %vm31_vm0 = vcmask 31744   ;;  %vm369_vm2 = vcmask 7168  }
   0x6   :  { %102 = vmatpush.bf16.msra.mxu0 %v517_v0  ;;  %v525_v2 = vld [vmem:[#allocation2 + $0x78] sm:$0xff]  ;;  %v515_v3 = vld [vmem:[#allocation2 + $0x28] sm:$0xff]  ;;  %v524_v4 = vld [vmem:[#allocation2 + $0x70] sm:$0xff] }
   0x7   :  { %186 = vmatpush.bf16.msra.mxu1 %v525_v2  ;;  %v523_v5 = vld [vmem:[#allocation2 + $0x68] sm:$0xff]  ;;  %v514_v6 = vld [vmem:[#allocation2 + $0x20] sm:$0xff]  ;;  %v513_v8 = vld [vmem:[#allocation2 + $0x18] sm:$0xff] }
   0x8   :  { %v522_v7 = vld [vmem:[#allocation2 + $0x60] sm:$0xff]  ;;  %v521_v9 = vld [vmem:[#allocation2 + $0x58] sm:$0xff]  ;;  %v512_v10 = vld [vmem:[#allocation2 + $0x10] sm:$0xff] }
   0x9   :  { %v520_v11 = vld [vmem:[#allocation2 + $0x50] sm:$0xff]  ;;  %v511_v12 = vld [vmem:[#allocation2 + $0x8] sm:$0xff]  ;;  %v510_v14 = vld [vmem:[#allocation2] sm:$0xff] }
   0xa   :  { %103 = vmatpush.bf16.msra.mxu0 %v516_v1  ;;  %v519_v13 = vld [vmem:[#allocation2 + $0x48] sm:$0xff]  ;;  %v30_v15 = vld [vmem:[%s619_s0] sm:$0xff]  ;;  %vm408_vm1 = vmpackc.low %vm31_vm0, %vm31_vm0 }
   0xb   :  { %187 = vmatpush.bf16.msra.mxu1 %v524_v4  ;;  %v409_v16 = vpack.c.bf16 %v30_v15, %v30_v15  ;;  %v518_v17 = vld [vmem:[#allocation2 + $0x40] sm:$0xff]  ;;  %v533_v18 = vld [vmem:[#allocation2 + $0xb8] sm:$0xff]  ;;  %v532_v19 = vld [vmem:[#allocation2 + $0xb0] sm:$0xff] }
   0xc   :  { %271 = vmatpush.bf16.msra.mxu2 %v533_v18  ;;  %v531_v20 = vld [vmem:[#allocation2 + $0xa8] sm:$0xff]  ;;  %v530_v21 = vld [vmem:[#allocation2 + $0xa0] sm:$0xff]  ;;  %v529_v22 = vld [vmem:[#allocation2 + $0x98] sm:$0xff] }
   0xd   :  { %v528_v23 = vld [vmem:[#allocation2 + $0x90] sm:$0xff]  ;;  %v545_v24 = vld [vmem:[%s621_s2] ss:$0 sm:$0xff]  ;;  %v527_v29 = vld [vmem:[#allocation2 + $0x88] sm:$0xff] }
   0xe   :  { %104 = vmatpush.bf16.msra.mxu0 %v515_v3  ;;  %v526_v30 = vld [vmem:[#allocation2 + $0x80] sm:$0xff]  ;;  %v541_v31 = vld [vmem:[#allocation2 + $0xf8] sm:$0xff]  ;;  %v540_v32 = vld [vmem:[#allocation2 + $0xf0] sm:$0xff] }
   0xf   :  { %188 = vmatpush.bf16.msra.mxu1 %v523_v5  ;;  %356 = vmatpush.bf16.msra.mxu3 %v541_v31  ;;  %v539_v33 = vld [vmem:[#allocation2 + $0xe8] sm:$0xff]  ;;  %v538_v34 = vld [vmem:[#allocation2 + $0xe0] sm:$0xff]  ;;  %v537_v35 = vld [vmem:[#allocation2 + $0xd8] sm:$0xff] }
  0x10   :  { %272 = vmatpush.bf16.msra.mxu2 %v532_v19  ;;  %v536_v36 = vld [vmem:[#allocation2 + $0xd0] sm:$0xff]  ;;  %v546_v37 = vld [vmem:[%s621_s2 + $0x1] ss:$0 sm:$0xff]  ;;  %v535_v43 = vld [vmem:[#allocation2 + $0xc8] sm:$0xff] }
  0x11   :  { %v534_v44 = vld [vmem:[#allocation2 + $0xc0] sm:$0xff] }
  0x12   :  { %105 = vmatpush.bf16.msra.mxu0 %v514_v6  ;;  %v547_v45 = vld [vmem:[%s621_s2 + $0x2] ss:$0 sm:$0xff]  ;;  %v548_v51 = vld [vmem:[%s621_s2 + $0x3] ss:$0 sm:$0xff] }
  0x13   :  { %189 = vmatpush.bf16.msra.mxu1 %v522_v7  ;;  %357 = vmatpush.bf16.msra.mxu3 %v540_v32 }
  0x14   :  { %273 = vmatpush.bf16.msra.mxu2 %v531_v20 }
  0x16   :  { %106 = vmatpush.bf16.msra.mxu0 %v513_v8 }
  0x17   :  { %190 = vmatpush.bf16.msra.mxu1 %v521_v9  ;;  %358 = vmatpush.bf16.msra.mxu3 %v539_v33 }
  0x18   :  { %274 = vmatpush.bf16.msra.mxu2 %v530_v21 }
  0x1a   :  { %107 = vmatpush.bf16.msra.mxu0 %v512_v10 }
  0x1b   :  { %191 = vmatpush.bf16.msra.mxu1 %v520_v11  ;;  %359 = vmatpush.bf16.msra.mxu3 %v538_v34 }
  0x1c   :  { %275 = vmatpush.bf16.msra.mxu2 %v529_v22 }
  0x1e   :  { %108 = vmatpush.bf16.msra.mxu0 %v511_v12 }
  0x1f   :  { %192 = vmatpush.bf16.msra.mxu1 %v519_v13  ;;  %360 = vmatpush.bf16.msra.mxu3 %v537_v35 }
  0x20   :  { %276 = vmatpush.bf16.msra.mxu2 %v528_v23 }
  0x22   :  { %109 = vmatpush.bf16.msra.mxu0 %v510_v14 }
  0x23   :  { %193 = vmatpush.bf16.msra.mxu1 %v518_v17  ;;  %361 = vmatpush.bf16.msra.mxu3 %v536_v36 }
  0x24   :  { %277 = vmatpush.bf16.msra.mxu2 %v527_v29 }
  0x25   :  { %410 = vmatmul.msk.bf16.vlgmr.msra.gmra.mxu0 %vm408_vm1, %v409_v16 }
  0x27   :  { %362 = vmatpush.bf16.msra.mxu3 %v535_v43 }
  0x28   :  { %278 = vmatpush.bf16.msra.mxu2 %v526_v30 }
  0x2b   :  { %363 = vmatpush.bf16.msra.mxu3 %v534_v44 }
  0xa2   :  { %v111_v25 = vpop.f32.mrf.mxu0 }
  0xa3   :  { %v112_v26 = vadd.f32 %v545_v24, %v111_v25 }
  0xa5   :  { %v134_v27 = vpack.c.bf16 %v112_v26, %v112_v26 }
  0xa7   :  { %194 = vmatmul.bf16.vlgmr.msra.gmra.mxu1 %v134_v27 }
  0xaa   :  { %v113_v28 = vpop.f32.mrf.mxu0 }
 0x124   :  { %v195_v38 = vpop.f32.mrf.mxu1 }
 0x125   :  { %v196_v39 = vadd.f32 %v546_v37, %v195_v38 }
 0x127   :  { %v199_v40 = vmax.f32 %v196_v39, 0.0 }
 0x129   :  { %v219_v41 = vpack.c.bf16 %v199_v40, %v199_v40 }
 0x12b   :  { %279 = vmatmul.bf16.vlgmr.msra.gmra.mxu2 %v219_v41 }
 0x12c   :  { %v197_v42 = vpop.f32.mrf.mxu1 }
 0x1ae   :  { %v280_v46 = vpop.f32.mrf.mxu2 }
 0x1af   :  { %v281_v47 = vadd.f32 %v547_v45, %v280_v46 }
 0x1b1   :  { %v284_v48 = vmax.f32 %v281_v47, 0.0 }
 0x1b3   :  { %v304_v49 = vpack.c.bf16 %v284_v48, %v284_v48 }
 0x1b5   :  { %364 = vmatmul.bf16.vlgmr.msra.gmra.mxu3 %v304_v49 }
 0x1b6   :  { %v282_v50 = vpop.f32.mrf.mxu2 }
 0x238   :  { %v365_v52 = vpop.f32.mrf.mxu3 }
 0x239   :  { %v366_v53 = vadd.f32 %v548_v51, %v365_v52 }
 0x23b   :  { %370 = vst.msk [vmem:[%s622_s3] sm:$0xff] %vm369_vm2, %v366_v53 }
 0x240   :  { %v367_v54 = vpop.f32.mrf.mxu3 }
 0x241   :  { %375 = vsyncpa [#allocation3], 1 }

// kernel: tpu_custom_call.1
= control target key start
LH: loop header
LB: loop body
LE: loop exit
PB: predicated region body
PF: predicated region fallthrough
CT: control target
= control target key end

     0   :  { %8 = vsyncpa [#allocation3], 0  ;;  %s575_s15 = smov [#allocation2]   ;;  %s576_s17 = smov 64   ;;  %s619_s0 = inlined_call_operand.vmem [shape: f32[8,4], index: 0, kind: input, shape index: {}]   ;;  %s620_s1 = inlined_call_operand.hbm [shape: bf16[4,128,128], index: 1, kind: input, shape index: {}]   ;;  %s621_s2 = inlined_call_operand.vmem [shape: f32[4,1,128], index: 2, kind: input, shape index: {}]   ;;  %s622_s3 = inlined_call_operand.vmem [shape: f32[8,1], index: 3, kind: output, shape index: {}]  }
   0x1   :  { %s15_s14 = sshll.u32 %s620_s1, 4  ;;  %s17_s16 = sshll.u32 %s575_s15, 4  ;;  %s16_s14 = int_to_ptr.hbm [resolvable:$true] %s15_s14  ;;  %s18_s16 = int_to_ptr.vmem [resolvable:$true] %s17_s16 }
   0x2   :  { %s577_s18 = smov 4  }
   0x3   :  { %23 = dma.hbm_to_vmem [thread:$0]  %s16_s14, 4096, %s18_s16, [#allocation3], %s576_s17, %s576_s17, %s577_s18  }
   0x4   :  { %573 = dma.done.wait [#allocation3], 4096  }
   0x5   :  { %574 = vsyncadd [#allocation3], 4294963200  ;;  %v517_v0 = vld [vmem:[#allocation2 + $0x38] sm:$0xff]  ;;  %v516_v1 = vld [vmem:[#allocation2 + $0x30] sm:$0xff]  ;;  %vm31_vm0 = vcmask 31744   ;;  %vm369_vm2 = vcmask 7168  }
   0x6   :  { %102 = vmatpush.bf16.msra.mxu0 %v517_v0  ;;  %v525_v2 = vld [vmem:[#allocation2 + $0x78] sm:$0xff]  ;;  %v515_v3 = vld [vmem:[#allocation2 + $0x28] sm:$0xff]  ;;  %v524_v4 = vld [vmem:[#allocation2 + $0x70] sm:$0xff] }
   0x7   :  { %186 = vmatpush.bf16.msra.mxu1 %v525_v2  ;;  %v523_v5 = vld [vmem:[#allocation2 + $0x68] sm:$0xff]  ;;  %v514_v6 = vld [vmem:[#allocation2 + $0x20] sm:$0xff]  ;;  %v513_v8 = vld [vmem:[#allocation2 + $0x18] sm:$0xff] }
   0x8   :  { %v522_v7 = vld [vmem:[#allocation2 + $0x60] sm:$0xff]  ;;  %v521_v9 = vld [vmem:[#allocation2 + $0x58] sm:$0xff]  ;;  %v512_v10 = vld [vmem:[#allocation2 + $0x10] sm:$0xff] }
   0x9   :  { %v520_v11 = vld [vmem:[#allocation2 + $0x50] sm:$0xff]  ;;  %v511_v12 = vld [vmem:[#allocation2 + $0x8] sm:$0xff]  ;;  %v510_v14 = vld [vmem:[#allocation2] sm:$0xff] }
   0xa   :  { %103 = vmatpush.bf16.msra.mxu0 %v516_v1  ;;  %v519_v13 = vld [vmem:[#allocation2 + $0x48] sm:$0xff]  ;;  %v30_v15 = vld [vmem:[%s619_s0] sm:$0xff]  ;;  %vm408_vm1 = vmpackc.low %vm31_vm0, %vm31_vm0 }
   0xb   :  { %187 = vmatpush.bf16.msra.mxu1 %v524_v4  ;;  %v409_v16 = vpack.c.bf16 %v30_v15, %v30_v15  ;;  %v518_v17 = vld [vmem:[#allocation2 + $0x40] sm:$0xff]  ;;  %v533_v18 = vld [vmem:[#allocation2 + $0xb8] sm:$0xff]  ;;  %v532_v19 = vld [vmem:[#allocation2 + $0xb0] sm:$0xff] }
   0xc   :  { %271 = vmatpush.bf16.msra.mxu2 %v533_v18  ;;  %v531_v20 = vld [vmem:[#allocation2 + $0xa8] sm:$0xff]  ;;  %v530_v21 = vld [vmem:[#allocation2 + $0xa0] sm:$0xff]  ;;  %v529_v22 = vld [vmem:[#allocation2 + $0x98] sm:$0xff] }
   0xd   :  { %v528_v23 = vld [vmem:[#allocation2 + $0x90] sm:$0xff]  ;;  %v545_v24 = vld [vmem:[%s621_s2] ss:$0 sm:$0xff]  ;;  %v527_v29 = vld [vmem:[#allocation2 + $0x88] sm:$0xff] }
   0xe   :  { %104 = vmatpush.bf16.msra.mxu0 %v515_v3  ;;  %v526_v30 = vld [vmem:[#allocation2 + $0x80] sm:$0xff]  ;;  %v541_v31 = vld [vmem:[#allocation2 + $0xf8] sm:$0xff]  ;;  %v540_v32 = vld [vmem:[#allocation2 + $0xf0] sm:$0xff] }
   0xf   :  { %188 = vmatpush.bf16.msra.mxu1 %v523_v5  ;;  %356 = vmatpush.bf16.msra.mxu3 %v541_v31  ;;  %v539_v33 = vld [vmem:[#allocation2 + $0xe8] sm:$0xff]  ;;  %v538_v34 = vld [vmem:[#allocation2 + $0xe0] sm:$0xff]  ;;  %v537_v35 = vld [vmem:[#allocation2 + $0xd8] sm:$0xff] }
  0x10   :  { %272 = vmatpush.bf16.msra.mxu2 %v532_v19  ;;  %v536_v36 = vld [vmem:[#allocation2 + $0xd0] sm:$0xff]  ;;  %v546_v37 = vld [vmem:[%s621_s2 + $0x1] ss:$0 sm:$0xff]  ;;  %v535_v43 = vld [vmem:[#allocation2 + $0xc8] sm:$0xff] }
  0x11   :  { %v534_v44 = vld [vmem:[#allocation2 + $0xc0] sm:$0xff] }
  0x12   :  { %105 = vmatpush.bf16.msra.mxu0 %v514_v6  ;;  %v547_v45 = vld [vmem:[%s621_s2 + $0x2] ss:$0 sm:$0xff]  ;;  %v548_v51 = vld [vmem:[%s621_s2 + $0x3] ss:$0 sm:$0xff] }
  0x13   :  { %189 = vmatpush.bf16.msra.mxu1 %v522_v7  ;;  %357 = vmatpush.bf16.msra.mxu3 %v540_v32 }
  0x14   :  { %273 = vmatpush.bf16.msra.mxu2 %v531_v20 }
  0x16   :  { %106 = vmatpush.bf16.msra.mxu0 %v513_v8 }
  0x17   :  { %190 = vmatpush.bf16.msra.mxu1 %v521_v9  ;;  %358 = vmatpush.bf16.msra.mxu3 %v539_v33 }
  0x18   :  { %274 = vmatpush.bf16.msra.mxu2 %v530_v21 }
  0x1a   :  { %107 = vmatpush.bf16.msra.mxu0 %v512_v10 }
  0x1b   :  { %191 = vmatpush.bf16.msra.mxu1 %v520_v11  ;;  %359 = vmatpush.bf16.msra.mxu3 %v538_v34 }
  0x1c   :  { %275 = vmatpush.bf16.msra.mxu2 %v529_v22 }
  0x1e   :  { %108 = vmatpush.bf16.msra.mxu0 %v511_v12 }
  0x1f   :  { %192 = vmatpush.bf16.msra.mxu1 %v519_v13  ;;  %360 = vmatpush.bf16.msra.mxu3 %v537_v35 }
  0x20   :  { %276 = vmatpush.bf16.msra.mxu2 %v528_v23 }
  0x22   :  { %109 = vmatpush.bf16.msra.mxu0 %v510_v14 }
  0x23   :  { %193 = vmatpush.bf16.msra.mxu1 %v518_v17  ;;  %361 = vmatpush.bf16.msra.mxu3 %v536_v36 }
  0x24   :  { %277 = vmatpush.bf16.msra.mxu2 %v527_v29 }
  0x25   :  { %410 = vmatmul.msk.bf16.vlgmr.msra.gmra.mxu0 %vm408_vm1, %v409_v16 }
  0x27   :  { %362 = vmatpush.bf16.msra.mxu3 %v535_v43 }
  0x28   :  { %278 = vmatpush.bf16.msra.mxu2 %v526_v30 }
  0x2b   :  { %363 = vmatpush.bf16.msra.mxu3 %v534_v44 }
  0xa2   :  { %v111_v25 = vpop.f32.mrf.mxu0 }
  0xa3   :  { %v112_v26 = vadd.f32 %v545_v24, %v111_v25 }
  0xa5   :  { %v134_v27 = vpack.c.bf16 %v112_v26, %v112_v26 }
  0xa7   :  { %194 = vmatmul.bf16.vlgmr.msra.gmra.mxu1 %v134_v27 }
  0xaa   :  { %v113_v28 = vpop.f32.mrf.mxu0 }
 0x124   :  { %v195_v38 = vpop.f32.mrf.mxu1 }
 0x125   :  { %v196_v39 = vadd.f32 %v546_v37, %v195_v38 }
 0x127   :  { %v199_v40 = vmax.f32 %v196_v39, 0.0 }
 0x129   :  { %v219_v41 = vpack.c.bf16 %v199_v40, %v199_v40 }
 0x12b   :  { %279 = vmatmul.bf16.vlgmr.msra.gmra.mxu2 %v219_v41 }
 0x12c   :  { %v197_v42 = vpop.f32.mrf.mxu1 }
 0x1ae   :  { %v280_v46 = vpop.f32.mrf.mxu2 }
 0x1af   :  { %v281_v47 = vadd.f32 %v547_v45, %v280_v46 }
 0x1b1   :  { %v284_v48 = vmax.f32 %v281_v47, 0.0 }
 0x1b3   :  { %v304_v49 = vpack.c.bf16 %v284_v48, %v284_v48 }
 0x1b5   :  { %364 = vmatmul.bf16.vlgmr.msra.gmra.mxu3 %v304_v49 }
 0x1b6   :  { %v282_v50 = vpop.f32.mrf.mxu2 }
 0x238   :  { %v365_v52 = vpop.f32.mrf.mxu3 }
 0x239   :  { %v366_v53 = vadd.f32 %v548_v51, %v365_v52 }
 0x23b   :  { %370 = vst.msk [vmem:[%s622_s3] sm:$0xff] %vm369_vm2, %v366_v53 }
 0x240   :  { %v367_v54 = vpop.f32.mrf.mxu3 }
 0x241   :  { %375 = vsyncpa [#allocation3], 1 }

</bundles_post_ra>
